<compile_context>
chip_gen: v5e
topology: v5e:2x2
jax: 0.10.0
libtpu: 0.0.40
codegen_flags: <defaults>
</compile_context>

<pallas_src>
import functools

import numpy as np
import jax
import jax.numpy as jnp
from jax import lax
from jax.experimental import pallas as pl
from jax.experimental.pallas import tpu as pltpu


def _round_up(a, b):
    return ((a + b - 1) // b) * b


def _drl_kernel(*refs, seq_len, tile_t, halo_t, pad_l, pad_r, dilation, kernel_size,
                has_left, has_right, mask_tail, compute_dtype):
    """One (sample, time-tile) per grid step.

    refs (in order): xc (1,tT,Cin) current tile (also the residual),
                     [xl (1,tH,Cin) left-halo block]  (only if has_left),
                     [xr (1,tH,Cin) right-halo block] (only if has_right),
                     wd (K*Cin,Cout), bd (1,Cout), w1 (Cout,Cout), b1 (1,Cout),
                     o  (1,tT,Cout)
    """
    it = iter(refs)
    xc_ref = next(it)
    xl_ref = next(it) if has_left else None
    xr_ref = next(it) if has_right else None
    wd_ref = next(it)
    bd_ref = next(it)
    w1_ref = next(it)
    b1_ref = next(it)
    o_ref = next(it)

    j = pl.program_id(1)
    tT = tile_t
    cin = xc_ref.shape[-1]

    x_cur = xc_ref[0]                                         # (tT, Cin)

    # Assemble the conv window [j*tT - pad_l, j*tT + tT + pad_r).  Only the tiny halo pieces
    # (and, statically only for a partial last tile, the current-tile tail) are zero-masked.
    pieces = []
    if pad_l > 0:
        if has_left:
            lp = xl_ref[0, pl.ds(halo_t - pad_l, pad_l), :]
            gl = j * tT - pad_l + lax.broadcasted_iota(jnp.int32, (pad_l, 1), 0)
            lp = jnp.where(gl >= 0, lp, jnp.zeros_like(lp))   # only j == 0 masks anything
        else:  # single-tile case: left pad rows are always outside the sequence
            lp = jnp.zeros((pad_l, cin), x_cur.dtype)
        pieces.append(lp)
    cur = x_cur
    if mask_tail:  # static: only emitted when T % tT != 0
        gc = j * tT + lax.broadcasted_iota(jnp.int32, (tT, 1), 0)
        cur = jnp.where(gc < seq_len, cur, jnp.zeros_like(cur))
    pieces.append(cur)
    if pad_r > 0:
        if has_right:
            rp = xr_ref[0, pl.ds(0, pad_r), :]
            gr = (j + 1) * tT + lax.broadcasted_iota(jnp.int32, (pad_r, 1), 0)
            rp = jnp.where(gr < seq_len, rp, jnp.zeros_like(rp))
        else:
            rp = jnp.zeros((pad_r, cin), x_cur.dtype)
        pieces.append(rp)
    asm = jnp.concatenate(pieces, axis=0) if len(pieces) > 1 else pieces[0]   # (win, Cin)

    # Dilated conv as K small MXU matmuls with f32 accumulation (kernel is not MXU-bound at
    # MS-TCN channel counts, so we skip the lane-repacking "packed taps" trick).
    wd = wd_ref[...]                                          # (K*Cin, Cout), compute_dtype
    cout = wd.shape[-1]
    acc = jnp.zeros((tT, cout), jnp.float32)
    for k in range(kernel_size):
        tap = asm[k * dilation: k * dilation + tT, :]
        acc = acc + jnp.dot(tap.astype(compute_dtype),
                            wd[k * cin:(k + 1) * cin, :],
                            preferred_element_type=jnp.float32)

    acc = acc + bd_ref[...]                                   # bias (f32)
    h = jnp.maximum(acc, 0.0)                                 # ReLU
    out = jnp.dot(h.astype(compute_dtype), w1_ref[...],
                  preferred_element_type=jnp.float32) + b1_ref[...]
    # dropout: eval-mode identity
    o_ref[0] = (x_cur.astype(jnp.float32) + out).astype(o_ref.dtype)


def dilated_residual_layer(x, wd, bd, w1, b1, *, dilation, causal_conv=False,
                           kernel_size=3, tile_t=1024, compute_dtype=jnp.bfloat16):
    """x: (N, T, C) channels-last (f32 or bf16).  wd: (K, Cin, Cout); w1: (Cin, Cout)."""
    N, T, Cin = x.shape
    K, Cin2, Cout = wd.shape
    # The PyTorch module's padding/slicing is only shape-consistent for kernel_size == 3.
    assert K == kernel_size == 3, "DilatedResidualLayer padding only matches kernel_size=3"
    assert Cin2 == Cin and Cout == Cin, "residual add requires in_channels == out_channels"
    assert dilation >= 1

    if causal_conv:
        pad_l, pad_r = dilation * (kernel_size - 1), 0        # == pad both sides + drop last 2d
    else:
        pad_l, pad_r = dilation, dilation

    # ---- choose the T tiling ----------------------------------------------------------------
    max_pad = max(pad_l, pad_r, 1)
    tH = _round_up(max(max_pad, 8), 8)        # halo block just left/right of the tile
    min_tile = 4 * tH                         # caps halo traffic at <=50% of the tile
    min_steps = 8                             # keep >= ~8 grid steps total (megacore / v7x 2 TCs)
    use_halo = False
    if T % 8 == 0 and T > min_tile:
        tT = _round_up(max(tile_t, min_tile), tH)
        steps_target = max(2, -(-min_steps // N))
        tT_par = _round_up(max(-(-T // steps_target), min_tile), tH)
        tT = min(tT, tT_par)
        use_halo = tT < T
    if not use_halo:
        tT, tH = T, 0
    nT = pl.cdiv(T, tT)
    has_left = use_halo and pad_l > 0
    has_right = use_halo and pad_r > 0        # causal mode: no right-halo DMA at all
    mask_tail = (T % tT) != 0                 # partial last tile (static)
    r = (tT // tH) if use_halo else 1
    nH = pl.cdiv(T, tH) if use_halo else 1

    # Weight repack: taps packed along the contraction dim; matmul operands in compute_dtype.
    wdp = wd.reshape(K * Cin, Cout).astype(compute_dtype)
    w1p = w1.astype(compute_dtype)
    bd2 = bd.reshape(1, Cout).astype(jnp.float32)
    b12 = b1.reshape(1, Cout).astype(jnp.float32)

    kernel = functools.partial(
        _drl_kernel, seq_len=T, tile_t=tT, halo_t=tH, pad_l=pad_l, pad_r=pad_r,
        dilation=dilation, kernel_size=K, has_left=has_left, has_right=has_right,
        mask_tail=mask_tail, compute_dtype=compute_dtype)

    in_specs = [pl.BlockSpec((1, tT, Cin), lambda n, j: (n, j, 0))]        # current tile
    inputs = [x]
    if has_left:
        in_specs.append(pl.BlockSpec((1, tH, Cin),
                                     lambda n, j: (n, jnp.maximum(j * r - 1, 0), 0)))
        inputs.append(x)
    if has_right:
        in_specs.append(pl.BlockSpec((1, tH, Cin),
                                     lambda n, j: (n, jnp.minimum(j * r + r, nH - 1), 0)))
        inputs.append(x)
    in_specs += [
        pl.BlockSpec((K * Cin, Cout), lambda n, j: (0, 0)),                # dilated-conv weight
        pl.BlockSpec((1, Cout), lambda n, j: (0, 0)),                      # dilated-conv bias
        pl.BlockSpec((Cout, Cout), lambda n, j: (0, 0)),                   # 1x1 weight
        pl.BlockSpec((1, Cout), lambda n, j: (0, 0)),                      # 1x1 bias
    ]
    inputs += [wdp, bd2, w1p, b12]

    # VMEM budget: double-buffered blocks + resident weights + in-kernel temporaries.
    # Keep at least the v6e/v7x default (32 MiB) so we only ever *raise* v5e's 16 MiB default.
    isz = lambda dt: np.dtype(dt).itemsize
    act_b = tT * Cin * isz(x.dtype)
    halo_b = (tH * Cin * isz(x.dtype)) if use_halo else 0
    out_b = tT * Cout * isz(x.dtype)
    w_b = (K * Cin * Cout + Cout * Cout) * isz(compute_dtype) + 2 * Cout * 4
    tmp_b = 6 * (tT + pad_l + pad_r) * max(Cin, Cout) * 4
    est = 2 * (act_b + 2 * halo_b + out_b) + 2 * w_b + tmp_b
    vmem_limit = int(min(48 * 2**20, max(4 * est, 32 * 2**20)))

    return pl.pallas_call(
        kernel,
        out_shape=jax.ShapeDtypeStruct((N, T, Cout), x.dtype),
        grid_spec=pltpu.PrefetchScalarGridSpec(
            num_scalar_prefetch=0,
            grid=(N, nT),
            in_specs=in_specs,
            out_specs=pl.BlockSpec((1, tT, Cout), lambda n, j: (n, j, 0)),
        ),
        compiler_params=pltpu.CompilerParams(
            dimension_semantics=("parallel", "parallel"),
            vmem_limit_bytes=vmem_limit),
    )(*inputs)


if __name__ == "__main__":
    key = jax.random.PRNGKey(0)
    N, C, K = 2, 8, 3

    kparam, kx = jax.random.split(key)
    kwd, kbd, kw1, kb1 = jax.random.split(kparam, 4)
    # PyTorch Conv1d weight shapes: conv_dilated.weight (Cout,Cin,K), conv_1x1.weight (Cout,Cin,1)
    wd_t = jax.random.normal(kwd, (C, C, K), jnp.float32) * 0.1
    bd = jax.random.normal(kbd, (C,), jnp.float32) * 0.1
    w1_t = jax.random.normal(kw1, (C, C, 1), jnp.float32) * 0.1
    b1 = jax.random.normal(kb1, (C,), jnp.float32) * 0.1

    # Repack for channels-last matmuls.
    wd = jnp.transpose(wd_t, (2, 1, 0))          # (K, Cin, Cout)
    w1 = jnp.transpose(w1_t[:, :, 0], (1, 0))    # (Cin, Cout)

    def reference(x_ntc_f32, dilation, causal):
        x_nct = jnp.transpose(x_ntc_f32, (0, 2, 1))
        pad = dilation * (K - 1) if causal else dilation
        conv = lax.conv_general_dilated(
            x_nct, wd_t, window_strides=(1,), padding=[(pad, pad)],
            rhs_dilation=(dilation,), dimension_numbers=("NCH", "OIH", "NCH"))
        if causal:
            conv = conv[:, :, : x_nct.shape[2]]   # == drop last 2*dilation
        h = jax.nn.relu(conv + bd[None, :, None])
        o = jnp.einsum("oc,nct->not", w1_t[:, :, 0], h) + b1[None, :, None]
        return jnp.transpose(x_nct + o, (0, 2, 1))

    configs = [
        # (T, dilation, causal, tile_t, compute_dtype, act_dtype, tol)
        (64, 2, False, 16, jnp.bfloat16, jnp.float32, 3e-2),   # multi-tile halo path, bf16 MXU
        (64, 4, True, 16, jnp.bfloat16, jnp.float32, 3e-2),    # causal: left halo only, no right DMA
        (16, 2, False, 512, jnp.float32, jnp.float32, 1e-4),   # single-tile path, f32
        (40, 2, False, 16, jnp.float32, jnp.float32, 1e-4),    # partial last tile (T % tT != 0)
        (64, 2, False, 16, jnp.bfloat16, jnp.bfloat16, 4e-2),  # bf16 activations in HBM
    ]
    for (T, dil, causal, tile_t, cdt, adt, tol) in configs:
        x32 = jax.random.normal(jax.random.fold_in(kx, 131 * T + dil), (N, T, C), jnp.float32)
        x_in = x32.astype(adt)
        out = dilated_residual_layer(x_in, wd, bd, w1, b1, dilation=dil,
                                     causal_conv=causal, tile_t=tile_t,
                                     compute_dtype=cdt)
        out = jax.block_until_ready(out).astype(jnp.float32)
        ref = reference(x_in.astype(jnp.float32), dil, causal)
        assert jnp.allclose(out, ref, atol=tol, rtol=tol), (
            f"mismatch T={T} dil={dil} causal={causal} act={adt}: "
            f"max err {float(jnp.max(jnp.abs(out - ref)))}")

    print("KERNEL_OK")
</pallas_src>

<mosaic_0001>
module attributes {stable_mosaic.version = 11 : i64} {
  func.func @_drl_kernel(%arg0: i32, %arg1: i32, %arg2: memref<1x32x8xf32, #tpu.memory_space<vmem>>, %arg3: memref<1x8x8xf32, #tpu.memory_space<vmem>>, %arg4: memref<1x8x8xf32, #tpu.memory_space<vmem>>, %arg5: memref<24x8xbf16, #tpu.memory_space<vmem>>, %arg6: memref<1x8xf32, #tpu.memory_space<vmem>>, %arg7: memref<8x8xbf16, #tpu.memory_space<vmem>>, %arg8: memref<1x8xf32, #tpu.memory_space<vmem>>, %arg9: memref<1x32x8xf32, #tpu.memory_space<vmem>>) attributes {dimension_semantics = [#tpu.dimension_semantics<parallel>, #tpu.dimension_semantics<parallel>], iteration_bounds = array<i64: 2, 2>, scalar_prefetch = 0 : i64, scratch_operands = 0 : i64, tpu.core_type = #tpu.core_type<tc>, window_params = [{transform_indices = @transform_0, window_bounds = array<i64: 1, 32, 8>}, {transform_indices = @transform_1, window_bounds = array<i64: 1, 8, 8>}, {transform_indices = @transform_2, window_bounds = array<i64: 1, 8, 8>}, {pipeline_mode = #tpu.pipeline_mode<synchronous>, transform_indices = @transform_3, window_bounds = array<i64: 24, 8>}, {pipeline_mode = #tpu.pipeline_mode<synchronous>, transform_indices = @transform_4, window_bounds = array<i64: 1, 8>}, {pipeline_mode = #tpu.pipeline_mode<synchronous>, transform_indices = @transform_5, window_bounds = array<i64: 8, 8>}, {pipeline_mode = #tpu.pipeline_mode<synchronous>, transform_indices = @transform_6, window_bounds = array<i64: 1, 8>}, {transform_indices = @transform_7, window_bounds = array<i64: 1, 32, 8>}]} {
    %c0 = arith.constant 0 : index
    %c0_0 = arith.constant 0 : index
    %c0_1 = arith.constant 0 : index
    %0 = vector.load %arg2[%c0, %c0_0, %c0_1] : memref<1x32x8xf32, #tpu.memory_space<vmem>>, vector<1x32x8xf32>
    %1 = vector.shape_cast %0 : vector<1x32x8xf32> to vector<32x8xf32>
    %c0_2 = arith.constant 0 : index
    %c6 = arith.constant 6 : index
    %c0_3 = arith.constant 0 : index
    %2 = vector.load %arg3[%c0_2, %c6, %c0_3] : memref<1x8x8xf32, #tpu.memory_space<vmem>>, vector<1x2x8xf32>
    %3 = vector.shape_cast %2 : vector<1x2x8xf32> to vector<2x8xf32>
    %c32_i32 = arith.constant 32 : i32
    %4 = arith.muli %arg1, %c32_i32 : i32
    %c2_i32 = arith.constant 2 : i32
    %5 = arith.subi %4, %c2_i32 : i32
    %6 = tpu.iota {dimensions = array<i32: 0>} : vector<2x1xi32>
    %7 = vector.broadcast %5 : i32 to vector<2x1xi32>
    %8 = arith.addi %7, %6 : vector<2x1xi32>
    %c0_i32 = arith.constant 0 : i32
    %9 = vector.broadcast %c0_i32 : i32 to vector<2x1xi32>
    %10 = arith.cmpi sge, %8, %9 : vector<2x1xi32>
    %cst = arith.constant 0.000000e+00 : f32
    %11 = vector.broadcast %cst : f32 to vector<2x8xf32>
    %12 = vector.shape_cast %10 : vector<2x1xi1> to vector<2x1xi1>
    %13 = vector.broadcast %12 : vector<2x1xi1> to vector<2x8xi1>
    %14 = arith.select %13, %3, %11 : vector<2x8xi1>, vector<2x8xf32>
    %c0_4 = arith.constant 0 : index
    %c0_5 = arith.constant 0 : index
    %c0_6 = arith.constant 0 : index
    %15 = vector.load %arg4[%c0_4, %c0_5, %c0_6] : memref<1x8x8xf32, #tpu.memory_space<vmem>>, vector<1x2x8xf32>
    %16 = vector.shape_cast %15 : vector<1x2x8xf32> to vector<2x8xf32>
    %c1_i32 = arith.constant 1 : i32
    %17 = arith.addi %arg1, %c1_i32 : i32
    %c32_i32_7 = arith.constant 32 : i32
    %18 = arith.muli %17, %c32_i32_7 : i32
    %19 = tpu.iota {dimensions = array<i32: 0>} : vector<2x1xi32>
    %20 = vector.broadcast %18 : i32 to vector<2x1xi32>
    %21 = arith.addi %20, %19 : vector<2x1xi32>
    %c64_i32 = arith.constant 64 : i32
    %22 = vector.broadcast %c64_i32 : i32 to vector<2x1xi32>
    %23 = arith.cmpi slt, %21, %22 : vector<2x1xi32>
    %cst_8 = arith.constant 0.000000e+00 : f32
    %24 = vector.broadcast %cst_8 : f32 to vector<2x8xf32>
    %25 = vector.shape_cast %23 : vector<2x1xi1> to vector<2x1xi1>
    %26 = vector.broadcast %25 : vector<2x1xi1> to vector<2x8xi1>
    %27 = arith.select %26, %16, %24 : vector<2x8xi1>, vector<2x8xf32>
    %28 = tpu.concatenate %14, %1, %27 in 0 : vector<2x8xf32>, vector<32x8xf32>, vector<2x8xf32> -> vector<36x8xf32>
    %c0_9 = arith.constant 0 : index
    %c0_10 = arith.constant 0 : index
    %29 = vector.load %arg5[%c0_9, %c0_10] : memref<24x8xbf16, #tpu.memory_space<vmem>>, vector<24x8xbf16>
    %cst_11 = arith.constant 0.000000e+00 : f32
    %30 = vector.broadcast %cst_11 : f32 to vector<32x8xf32>
    %31 = vector.extract_strided_slice %28 {offsets = [0, 0], sizes = [32, 8], strides = [1, 1]} : vector<36x8xf32> to vector<32x8xf32>
    %32 = arith.truncf %31 : vector<32x8xf32> to vector<32x8xbf16>
    %33 = vector.extract_strided_slice %29 {offsets = [0, 0], sizes = [8, 8], strides = [1, 1]} : vector<24x8xbf16> to vector<8x8xbf16>
    %cst_12 = arith.constant dense<0.000000e+00> : vector<32x8xf32>
    %34 = tpu.matmul %32, %33, %cst_12 {dimension_numbers = #tpu.dot_dimension_numbers<[1], [0], [0], [1], [0, 0, 1, 1], [], []>} : vector<32x8xbf16>, vector<8x8xbf16>, vector<32x8xf32> -> vector<32x8xf32>
    %35 = arith.addf %30, %34 : vector<32x8xf32>
    %36 = vector.extract_strided_slice %28 {offsets = [2, 0], sizes = [32, 8], strides = [1, 1]} : vector<36x8xf32> to vector<32x8xf32>
    %37 = arith.truncf %36 : vector<32x8xf32> to vector<32x8xbf16>
    %38 = vector.extract_strided_slice %29 {offsets = [8, 0], sizes = [8, 8], strides = [1, 1]} : vector<24x8xbf16> to vector<8x8xbf16>
    %cst_13 = arith.constant dense<0.000000e+00> : vector<32x8xf32>
    %39 = tpu.matmul %37, %38, %cst_13 {dimension_numbers = #tpu.dot_dimension_numbers<[1], [0], [0], [1], [0, 0, 1, 1], [], []>} : vector<32x8xbf16>, vector<8x8xbf16>, vector<32x8xf32> -> vector<32x8xf32>
    %40 = arith.addf %35, %39 : vector<32x8xf32>
    %41 = vector.extract_strided_slice %28 {offsets = [4, 0], sizes = [32, 8], strides = [1, 1]} : vector<36x8xf32> to vector<32x8xf32>
    %42 = arith.truncf %41 : vector<32x8xf32> to vector<32x8xbf16>
    %43 = vector.extract_strided_slice %29 {offsets = [16, 0], sizes = [8, 8], strides = [1, 1]} : vector<24x8xbf16> to vector<8x8xbf16>
    %cst_14 = arith.constant dense<0.000000e+00> : vector<32x8xf32>
    %44 = tpu.matmul %42, %43, %cst_14 {dimension_numbers = #tpu.dot_dimension_numbers<[1], [0], [0], [1], [0, 0, 1, 1], [], []>} : vector<32x8xbf16>, vector<8x8xbf16>, vector<32x8xf32> -> vector<32x8xf32>
    %45 = arith.addf %40, %44 : vector<32x8xf32>
    %c0_15 = arith.constant 0 : index
    %c0_16 = arith.constant 0 : index
    %46 = vector.load %arg6[%c0_15, %c0_16] : memref<1x8xf32, #tpu.memory_space<vmem>>, vector<1x8xf32>
    %47 = vector.broadcast %46 : vector<1x8xf32> to vector<32x8xf32>
    %48 = arith.addf %45, %47 : vector<32x8xf32>
    %cst_17 = arith.constant 0.000000e+00 : f32
    %49 = vector.broadcast %cst_17 : f32 to vector<32x8xf32>
    %50 = arith.maximumf %48, %49 : vector<32x8xf32>
    %51 = arith.truncf %50 : vector<32x8xf32> to vector<32x8xbf16>
    %c0_18 = arith.constant 0 : index
    %c0_19 = arith.constant 0 : index
    %52 = vector.load %arg7[%c0_18, %c0_19] : memref<8x8xbf16, #tpu.memory_space<vmem>>, vector<8x8xbf16>
    %cst_20 = arith.constant dense<0.000000e+00> : vector<32x8xf32>
    %53 = tpu.matmul %51, %52, %cst_20 {dimension_numbers = #tpu.dot_dimension_numbers<[1], [0], [0], [1], [0, 0, 1, 1], [], []>} : vector<32x8xbf16>, vector<8x8xbf16>, vector<32x8xf32> -> vector<32x8xf32>
    %c0_21 = arith.constant 0 : index
    %c0_22 = arith.constant 0 : index
    %54 = vector.load %arg8[%c0_21, %c0_22] : memref<1x8xf32, #tpu.memory_space<vmem>>, vector<1x8xf32>
    %55 = vector.broadcast %54 : vector<1x8xf32> to vector<32x8xf32>
    %56 = arith.addf %53, %55 : vector<32x8xf32>
    %57 = arith.addf %1, %56 : vector<32x8xf32>
    %c0_23 = arith.constant 0 : index
    %c0_24 = arith.constant 0 : index
    %c0_25 = arith.constant 0 : index
    %58 = vector.load %arg9[%c0_23, %c0_24, %c0_25] : memref<1x32x8xf32, #tpu.memory_space<vmem>>, vector<1x32x8xf32>
    %59 = vector.shape_cast %58 : vector<1x32x8xf32> to vector<32x8xf32>
    %60 = vector.shape_cast %57 : vector<32x8xf32> to vector<1x32x8xf32>
    tpu.vector_store %arg9[%c0_23, %c0_24, %c0_25], %60 {strides = array<i32>} : memref<1x32x8xf32, #tpu.memory_space<vmem>>, vector<1x32x8xf32>,
    return
  }
  func.func @transform_0(%arg0: i32, %arg1: i32) -> (i32, i32, i32) {
    %c0_i32 = arith.constant 0 : i32
    %c0_i32_0 = arith.constant 0 : i32
    return %arg0, %arg1, %c0_i32 : i32, i32, i32
  }
  func.func @transform_1(%arg0: i32, %arg1: i32) -> (i32, i32, i32) {
    %c4_i32 = arith.constant 4 : i32
    %0 = arith.muli %arg1, %c4_i32 : i32
    %c1_i32 = arith.constant 1 : i32
    %1 = arith.subi %0, %c1_i32 : i32
    %c0_i32 = arith.constant 0 : i32
    %2 = arith.maxsi %1, %c0_i32 : i32
    %c0_i32_0 = arith.constant 0 : i32
    %c0_i32_1 = arith.constant 0 : i32
    return %arg0, %2, %c0_i32_0 : i32, i32, i32
  }
  func.func @transform_2(%arg0: i32, %arg1: i32) -> (i32, i32, i32) {
    %c4_i32 = arith.constant 4 : i32
    %0 = arith.muli %arg1, %c4_i32 : i32
    %c4_i32_0 = arith.constant 4 : i32
    %1 = arith.addi %0, %c4_i32_0 : i32
    %c7_i32 = arith.constant 7 : i32
    %2 = arith.minsi %1, %c7_i32 : i32
    %c0_i32 = arith.constant 0 : i32
    %c0_i32_1 = arith.constant 0 : i32
    return %arg0, %2, %c0_i32 : i32, i32, i32
  }
  func.func @transform_3(%arg0: i32, %arg1: i32) -> (i32, i32) {
    %c0_i32 = arith.constant 0 : i32
    %c0_i32_0 = arith.constant 0 : i32
    %c0_i32_1 = arith.constant 0 : i32
    return %c0_i32, %c0_i32_0 : i32, i32
  }
  func.func @transform_4(%arg0: i32, %arg1: i32) -> (i32, i32) {
    %c0_i32 = arith.constant 0 : i32
    %c0_i32_0 = arith.constant 0 : i32
    %c0_i32_1 = arith.constant 0 : i32
    return %c0_i32, %c0_i32_0 : i32, i32
  }
  func.func @transform_5(%arg0: i32, %arg1: i32) -> (i32, i32) {
    %c0_i32 = arith.constant 0 : i32
    %c0_i32_0 = arith.constant 0 : i32
    %c0_i32_1 = arith.constant 0 : i32
    return %c0_i32, %c0_i32_0 : i32, i32
  }
  func.func @transform_6(%arg0: i32, %arg1: i32) -> (i32, i32) {
    %c0_i32 = arith.constant 0 : i32
    %c0_i32_0 = arith.constant 0 : i32
    %c0_i32_1 = arith.constant 0 : i32
    return %c0_i32, %c0_i32_0 : i32, i32
  }
  func.func @transform_7(%arg0: i32, %arg1: i32) -> (i32, i32, i32) {
    %c0_i32 = arith.constant 0 : i32
    %c0_i32_0 = arith.constant 0 : i32
    return %arg0, %arg1, %c0_i32 : i32, i32, i32
  }
}

</mosaic_0001>

<bundles_post_ra>
// kernel: tpu_custom_call.1
= control target key start
LH: loop header
LB: loop body
LE: loop exit
PB: predicated region body
PF: predicated region fallthrough
CT: control target
= control target key end

     0   :  { %s946_s24 = smov 0   ;;  %s948_s25 = smov 0   ;;  %s1079_s0 = inlined_call_operand.vmem [shape: f32[2,64,8], index: 0, kind: input, shape index: {}]   ;;  %s1080_s1 = inlined_call_operand.vmem [shape: f32[2,64,8], index: 1, kind: input, shape index: {}]   ;;  %s1081_s2 = inlined_call_operand.vmem [shape: f32[2,64,8], index: 2, kind: input, shape index: {}]   ;;  %s1082_s3 = inlined_call_operand.vmem [shape: bf16[24,8], index: 3, kind: input, shape index: {}]   ;;  %s1083_s4 = inlined_call_operand.vmem [shape: f32[1,8], index: 4, kind: input, shape index: {}]   ;;  %s1084_s5 = inlined_call_operand.vmem [shape: bf16[8,8], index: 5, kind: input, shape index: {}]   ;;  %s1085_s6 = inlined_call_operand.vmem [shape: f32[1,8], index: 6, kind: input, shape index: {}]   ;;  %s1086_s7 = inlined_call_operand.vmem [shape: f32[2,64,8], index: 7, kind: output, shape index: {}]  }
   0x1   :  { %s950_s26 = smov 0   ;;  %s952_s27 = smov 0  }
   0x2   :  { %s954_s28 = smov 0  }
   0x3 LB: > { %s26_s29 = sadd.s32 1, %s896_s26  ;;  %s29_s30 = sadd.s32 1, %s900_s27  ;;  %s904_s28 = sphi %s954_s28, %s17_s28   ;;  %s900_s27 = sphi %s952_s27, %s1091_s27   ;;  %s896_s26 = sphi %s950_s26, %s1090_s26   ;;  %s892_s25 = sphi %s948_s25, %s1089_s25   ;;  %s888_s24 = sphi %s946_s24, %s1088_s24  }
   0x4   : > { %p27_p0 = scmp.ge.s32.totalorder %s26_s29, 2  ;;  %p785_p1 = scmp.ge.s32.totalorder %s904_s28, 1 }
   0x5   : > { %p320_p2 = scmp.lt.s32.totalorder %s904_s28, 5 }
   0x6   : > { %s1093_s29 = smov (%p27_p0, %s26_s29), 0  ;;  %s1095_s30 = smov (!%p27_p0, %s29_s30), %s900_s27 }
   0x7   : > { %p321_p3 = pnand %p785_p1, %p320_p2  ;;  %p31_p4 = scmp.ge.s32.totalorder %s1095_s30, 2 }
   0x8   : > { %s786_s12 = sshll.u32 (!%p321_p3), %s888_s24, 2  ;;  %p385_p5 = scmp.lt.s32.totalorder (!%p321_p3), %s892_s25, 1 }
   0x9   : > { %s1097_s30 = smov (%p31_p4, %s1095_s30), 0  ;;  %324 = sbr.rel (%p321_p3) target bundleno = 342 (0x156), region = 48 }
   0xa   : > { %p387_p6 = scmp.lt.s32.totalorder (!%p321_p3), %s786_s12, 7  ;;  %s790_s13 = sadd.s32 (!%p321_p3), 4294967295, %s786_s12 }
   0xb   : > { %s411_s14 = sadd.s32 (!%p321_p3), 4, %s786_s12  ;;  %p396_p7 = scmp.gt.s32.totalorder (!%p321_p3), %s790_s13, 0 }
   0xc   : > { %p791_p8 = scmp.lt.s32.totalorder (!%p321_p3), %s790_s13, 7  ;;  %p993_p9 = scmp.lt.s32.totalorder (!%p321_p3), %s411_s14, 7 }
   0xd   : > { %s807_s8 = sshll.u32 (!%p321_p3), %s888_s24, 5 }
   0xe   : > { %v483_v0 = vld [vmem:[%s1082_s3] sm:$0xf]  ;;  %vm505_vm0 = vcmask 1043456   ;;  %v484_v1 = vld [vmem:[%s1082_s3 + $0x4] sm:$0xf]  ;;  %s1099_s25 = smov (!%p385_p5, %s892_s25), 1  ;;  %v444_v6 = vlaneseq }
   0xf   : > { %v535_v2 = vsel %vm505_vm0, %v483_v0, 0  ;;  %v507_v3 = vsel %vm505_vm0, %v484_v1, 0  ;;  %v485_v4 = vld [vmem:[%s1082_s3 + $0x8] sm:$0xf]  ;;  %s1101_s12 = smov (!%p387_p6, %s786_s12), 7  ;;  %s787_s17 = sshll.u32 %s1099_s25, 3 }
  0x10   : > { %544 = vmatpush.bf16.msra.mxu1 %v535_v2  ;;  %516 = vmatpush.bf16.msra.mxu0 %v507_v3  ;;  %v569_v5 = vsel %vm505_vm0, %v485_v4, 0  ;;  %s390_s18 = sadd.s32 %s787_s17, %s1101_s12  ;;  %s1103_s14 = smov (!%p993_p9, %s411_s14), 7  ;;  %vm465_vm1 = vcmask 1041408   ;;  %v445_v13 = vshrl.u32 %v444_v6, 7  ;;  %vm498_vm3 = vcmask 64512  }
  0x11   : > { %578 = vmatpush.bf16.msra.mxu2 %v569_v5  ;;  %s991_s19 = sshll.u32 %s390_s18, 3  ;;  %s1107_s14 = smov (!%p993_p9, %s1103_s14), 7  ;;  %vm492_vm5 = vcmask 1046528   ;;  %vm556_vm6 = vcmask 1045504   ;;  %v608_v43 = vld [vmem:[%s1084_s5] sm:$0xf] }
  0x12   : > { %s392_s23 = scalar_lea.vmem %s1079_s0, %s991_s19  ;;  %s808_s25 = sadd.s32 4294967294, %s807_s8  ;;  %v620_v44 = vsel %vm505_vm0, %v608_v43, 0  ;;  %v864_v52 = vld [vmem:[%s1083_s4] ss:$0 sm:$0xff] }
  0x13   : > { %s397_s9 = scalar_select %p396_p7, %s790_s13, 0  ;;  %v1002_v7 = vld [vmem:[%s392_s23 + $0x8] sm:$0xff]  ;;  %v1004_v8 = vld [vmem:[%s392_s23 + $0x10] sm:$0xff]  ;;  %v1008_v9 = vld [vmem:[%s392_s23] sm:$0xff]  ;;  %v446_v18 = vstv %s808_s25  ;;  %629 = vmatpush.bf16.msra.mxu3 %v620_v44 }
  0x14   : > { %v467_v10 = vrot.slane %v1002_v7, 6  ;;  %v1011_v11 = vld [vmem:[%s392_s23 + $0x18] sm:$0xff]  ;;  %v469_v12 = vrot.slane %v1004_v8, 6  ;;  %v466_v15 = vrot.slane %v1008_v9, 6  ;;  %s419_s11 = sadd.s32 %s787_s17, %s1107_s14  ;;  %v447_v19 = vadd.s32 %v446_v18, %v445_v13  ;;  %s823_s22 = sadd.s32 32, %s807_s8 }
  0x15   : > { %s1105_s9 = smov (!%p791_p8, %s397_s9), 7  ;;  %v471_v14 = vrot.slane %v1011_v11, 6  ;;  %s803_s16 = sshll.u32 %s419_s11, 3  ;;  %v455_v22 = vstv %s823_s22 }
  0x16   : > { %s403_s24 = sadd.s32 %s1105_s9, %s787_s17  ;;  %v470_v16 = vsel %vm465_vm1, %v467_v10, %v469_v12  ;;  %s421_s21 = scalar_lea.vmem %s1081_s2, %s803_s16  ;;  %vm448_vm2 = vcmp.ge.s32.totalorder %v447_v19, 0  ;;  %v468_v23 = vsel %vm465_vm1, %v466_v15, %v467_v10  ;;  %v456_v25 = vadd.s32 %v455_v22, %v445_v13 }
  0x17   : > { %v472_v17 = vsel %vm465_vm1, %v469_v12, %v471_v14  ;;  %s797_s10 = sshll.u32 %s403_s24, 3  ;;  %v452_v26 = vld [vmem:[%s421_s21] sm:$0x3]  ;;  %s434_s11 = scalar_lea.vmem %s1086_s7, %s991_s19 }
  0x18   : > { %s405_s13 = scalar_lea.vmem %s1080_s1, %s797_s10  ;;  %v487_v21 = vpack.c.bf16 %v472_v17, %v470_v16  ;;  %vm457_vm4 = vcmp.lt.s32.totalorder %v456_v25, 64  ;;  %v865_v16 = vld [vmem:[%s1085_s6] ss:$0 sm:$0xff] }
  0x19   : > { %v441_v20 = vld [vmem:[%s405_s13 + $0x6] sm:$0x3]  ;;  %v460_v31 = vsel %vm457_vm4, %v452_v26, 0.0 }
  0x1a   : > { %v451_v24 = vsel %vm448_vm2, %v441_v20, 0.0  ;;  %v494_v29 = vrot.slane %v487_v21, 1  ;;  %v558_v30 = vrot.slane %v487_v21, 2  ;;  %v479_v34 = vrot.slane %v460_v31, 6 }
  0x1b   : > { %v481_v27 = vsel %vm465_vm1, %v451_v24, %v466_v15 }
  0x1c   : > { %v486_v28 = vpack.c.bf16 %v468_v23, %v481_v27  ;;  %v482_v37 = vsel %vm465_vm1, %v471_v14, %v479_v34 }
  0x1d   : > { %v488_v38 = vpack.c.bf16 %v482_v37, %v482_v37 }
  0x1e   : > { %812 = vmatmul.msk.bf16.vlgmr.msra.gmra.mxu1 %vm498_vm3, %v486_v28  ;;  %v493_v32 = vrot.slane %v486_v28, 1  ;;  %v557_v33 = vrot.slane %v486_v28, 2 }
  0x1f   : > { %v496_v39 = vrot.slane %v488_v38, 1  ;;  %v560_v40 = vrot.slane %v488_v38, 2 }
  0x20   : > { %v495_v35 = vsel %vm492_vm5, %v493_v32, %v494_v29  ;;  %v559_v36 = vsel %vm556_vm6, %v557_v33, %v558_v30 }
  0x21   : > { %810 = vmatmul.msk.bf16.vlgmr.msra.gmra.mxu0 %vm498_vm3, %v495_v35  ;;  %814 = vmatmul.msk.bf16.vlgmr.msra.gmra.mxu2 %vm498_vm3, %v559_v36  ;;  %v497_v41 = vsel %vm492_vm5, %v494_v29, %v496_v39  ;;  %v561_v42 = vsel %vm556_vm6, %v558_v30, %v560_v40 }
  0x2e   : > { %813 = vmatmul.msk.bf16.gmra.mxu1 %vm498_vm3, %v487_v21 }
  0x31   : > { %811 = vmatmul.msk.bf16.gmra.mxu0 %vm498_vm3, %v497_v41  ;;  %815 = vmatmul.msk.bf16.gmra.mxu2 %vm498_vm3, %v561_v42 }
  0x9b   : > { %v546_v45 = vpop.f32.mrf.mxu1 }
  0x9e   : > { %v518_v46 = vpop.f32.mrf.mxu0 }
  0x9f   : > { %v547_v48 = vadd.f32 %v546_v45, %v518_v46 }
  0xa3   : > { %v548_v49 = vpop.f32.mrf.mxu1 }
  0xa4   : > { %v580_v47 = vpop.f32.mrf.mxu2 }
  0xa5   : > { %v590_v51 = vadd.f32 %v580_v47, %v547_v48 }
  0xa6   : > { %v520_v50 = vpop.f32.mrf.mxu0 }
  0xa7   : > { %v549_v53 = vadd.f32 %v548_v49, %v520_v50  ;;  %v598_v55 = vadd.f32 %v864_v52, %v590_v51 }
  0xa9   : > { %v602_v60 = vmax.f32 %v598_v55, 0.0 }
  0xab   : > { %v551_v59 = vpop.f32.mrf.mxu1 }
  0xac   : > { %v582_v54 = vpop.f32.mrf.mxu2 }
  0xad   : > { %v591_v56 = vadd.f32 %v582_v54, %v549_v53 }
  0xae   : > { %v523_v57 = vpop.f32.mrf.mxu0 }
  0xaf   : > { %v599_v58 = vadd.f32 %v864_v52, %v591_v56  ;;  %v552_v0 = vadd.f32 %v551_v59, %v523_v57 }
  0xb1   : > { %v603_v61 = vmax.f32 %v599_v58, 0.0 }
  0xb3   : > { %v606_v62 = vpack.c.bf16 %v603_v61, %v602_v60  ;;  %v553_v3 = vpop.f32.mrf.mxu1 }
  0xb4   : > { %v585_v63 = vpop.f32.mrf.mxu2 }
  0xb5   : > { %816 = vmatmul.msk.bf16.vlgmr.msra.gmra.mxu3 %vm498_vm3, %v606_v62  ;;  %v592_v2 = vadd.f32 %v585_v63, %v552_v0 }
  0xb6   : > { %v525_v1 = vpop.f32.mrf.mxu0 }
  0xb7   : > { %v554_v4 = vadd.f32 %v553_v3, %v525_v1  ;;  %v600_v6 = vadd.f32 %v864_v52, %v592_v2 }
  0xb9   : > { %v604_v13 = vmax.f32 %v600_v6, 0.0 }
  0xbc   : > { %v587_v5 = vpop.f32.mrf.mxu2 }
  0xbd   : > { %v593_v10 = vadd.f32 %v587_v5, %v554_v4 }
  0xbf   : > { %v601_v12 = vadd.f32 %v864_v52, %v593_v10 }
  0xc1   : > { %v605_v14 = vmax.f32 %v601_v12, 0.0 }
  0xc3   : > { %v607_v15 = vpack.c.bf16 %v605_v14, %v604_v13 }
  0xc5   : > { %817 = vmatmul.msk.bf16.gmra.mxu3 %vm498_vm3, %v607_v15 }
 0x138   : > { %v631_v17 = vpop.f32.mrf.mxu3 }
 0x139   : > { %v632_v18 = vadd.f32 %v865_v16, %v631_v17 }
 0x13b   : > { %v641_v19 = vadd.f32 %v632_v18, %v1008_v9 }
 0x13d   : > { %645 = vst.msk [vmem:[%s434_s11] sm:$0xff] %vm498_vm3, %v641_v19 }
 0x140   : > { %v633_v20 = vpop.f32.mrf.mxu3 }
 0x141   : > { %v634_v21 = vadd.f32 %v865_v16, %v633_v20 }
 0x143   : > { %v642_v22 = vadd.f32 %v634_v21, %v1002_v7 }
 0x145   : > { %646 = vst.msk [vmem:[%s434_s11 + $0x8] sm:$0xff] %vm498_vm3, %v642_v22 }
 0x148   : > { %v636_v23 = vpop.f32.mrf.mxu3 }
 0x149   : > { %v637_v24 = vadd.f32 %v865_v16, %v636_v23 }
 0x14b   : > { %v643_v25 = vadd.f32 %v637_v24, %v1004_v8 }
 0x14d   : > { %647 = vst.msk [vmem:[%s434_s11 + $0x10] sm:$0xff] %vm498_vm3, %v643_v25 }
 0x150   : > { %v638_v26 = vpop.f32.mrf.mxu3 }
 0x151   : > { %v639_v27 = vadd.f32 %v865_v16, %v638_v26 }
 0x153   : > { %v644_v28 = vadd.f32 %v639_v27, %v1011_v11 }
 0x155   : > { %648 = vst.msk [vmem:[%s434_s11 + $0x18] sm:$0xff] %vm498_vm3, %v644_v28 }
 0x156 PF: > { %s17_s28 = sadd.s32 1, %s904_s28   ;;  %s1088_s24 = smov %s896_s26 }
 0x157   : > { %p14_p10 = scmp.ge.s32.totalorder %s17_s28, 6   ;;  %s1089_s25 = smov %s900_s27 }
 0x158   : > { %s1090_s26 = smov %s1093_s29  ;;  %s1091_s27 = smov %s1097_s30 }
 0x159   :  { %16 = sbr.rel (!%p14_p10) target bundleno = 3 (0x3), region = 84 }

</bundles_post_ra>
